<compile_context>
chip_gen: v6e
topology: v6e:2x2x1
jax: 0.10.0
libtpu: 0.0.40
codegen_flags: <defaults>
</compile_context>

<pallas_src>
import functools

import jax
import jax.numpy as jnp
from jax.experimental import pallas as pl
from jax.experimental.pallas import tpu as pltpu

INPUT_SIZE = 2 * 35 + 3   # 73
HIDDEN_SIZE = 1024
OUTPUT_SIZE = 35

_LANE = 128               # lane width
_SUB = 16                 # bf16 sublane packing


def _round_up(n, m):
    return ((n + m - 1) // m) * m


def _ff_kernel(x_ref, w1_ref, b1_ref, w2_ref, b2_ref, o_ref):
    # fc1: (TB, IN_P) bf16 @ (IN_P, HID) bf16 -> f32 accumulate on the MXU.
    h = jnp.dot(x_ref[...], w1_ref[...], preferred_element_type=jnp.float32)
    h = h + b1_ref[...]                       # (TB, HID) + (1, HID) f32
    # LeakyReLU, default negative_slope = 0.01.
    h = jnp.where(h >= 0, h, 0.01 * h)
    # fc2: downcast hidden to bf16 for the MXU, accumulate in f32.
    o = jnp.dot(h.astype(w2_ref.dtype), w2_ref[...],
                preferred_element_type=jnp.float32)
    o = o + b2_ref[...]                       # (TB, OUT_P) + (1, OUT_P) f32
    o_ref[...] = o.astype(o_ref.dtype)


@functools.partial(jax.jit, static_argnames=("tb",))
def my_model_ff(x, w1, b1, w2, b2, *, tb=256):
    """x: (B, 73) f32; w1: (73, 1024); b1: (1024,); w2: (1024, 35); b2: (35,)."""
    B, in_dim = x.shape
    hid = w1.shape[1]
    out_dim = w2.shape[1]

    in_p = _round_up(in_dim, _LANE)     # 73  -> 128
    out_p = _round_up(out_dim, _LANE)   # 35  -> 128

    # Batch tile: multiple of 16 (bf16 sublane packing), capped by padded B.
    tb_eff = min(_round_up(tb, _SUB), _round_up(B, _SUB))
    b_pad = _round_up(B, tb_eff)

    # --- array prep: bf16 weights/activations, zero-padded to lane alignment ---
    x_p = jnp.pad(x, ((0, b_pad - B), (0, in_p - in_dim))).astype(jnp.bfloat16)
    w1_p = jnp.pad(w1, ((0, in_p - in_dim), (0, 0))).astype(jnp.bfloat16)
    w2_p = jnp.pad(w2, ((0, 0), (0, out_p - out_dim))).astype(jnp.bfloat16)
    b1_2d = b1.reshape(1, hid).astype(jnp.float32)
    b2_2d = jnp.pad(b2, (0, out_p - out_dim)).reshape(1, out_p).astype(jnp.float32)

    grid = (b_pad // tb_eff,)

    out_padded = pl.pallas_call(
        _ff_kernel,
        out_shape=jax.ShapeDtypeStruct((b_pad, out_p), jnp.float32),
        grid_spec=pltpu.PrefetchScalarGridSpec(
            num_scalar_prefetch=0,
            grid=grid,
            in_specs=[
                pl.BlockSpec((tb_eff, in_p), lambda i: (i, 0)),   # x tile
                pl.BlockSpec((in_p, hid), lambda i: (0, 0)),      # w1 (resident)
                pl.BlockSpec((1, hid), lambda i: (0, 0)),         # b1 (resident)
                pl.BlockSpec((hid, out_p), lambda i: (0, 0)),     # w2 (resident)
                pl.BlockSpec((1, out_p), lambda i: (0, 0)),       # b2 (resident)
            ],
            out_specs=pl.BlockSpec((tb_eff, out_p), lambda i: (i, 0)),
        ),
        compiler_params=pltpu.CompilerParams(
            dimension_semantics=("parallel",),   # shard batch tiles on v7x megacore
        ),
    )(x_p, w1_p, b1_2d, w2_p, b2_2d)

    # Slice away batch padding and the zero-padded output lanes (128 -> 35).
    return out_padded[:B, :out_dim]


def _reference_bf16(x, w1, b1, w2, b2):
    """Emulates the kernel's bf16-weight / f32-accumulate numerics."""
    xb = x.astype(jnp.bfloat16).astype(jnp.float32)
    w1b = w1.astype(jnp.bfloat16).astype(jnp.float32)
    w2b = w2.astype(jnp.bfloat16).astype(jnp.float32)
    h = xb @ w1b + b1
    h = jnp.where(h >= 0, h, 0.01 * h)
    hb = h.astype(jnp.bfloat16).astype(jnp.float32)
    return hb @ w2b + b2


if __name__ == "__main__":
    key = jax.random.PRNGKey(0)
    kx, k1, kb1, k2, kb2 = jax.random.split(key, 5)

    B = 8
    x = jax.random.normal(kx, (B, INPUT_SIZE), dtype=jnp.float32)

    # Deterministic parameter init (PyTorch-Linear-like uniform scaling).
    bound1 = 1.0 / (INPUT_SIZE ** 0.5)
    w1 = jax.random.uniform(k1, (INPUT_SIZE, HIDDEN_SIZE),
                            minval=-bound1, maxval=bound1, dtype=jnp.float32)
    b1 = jax.random.uniform(kb1, (HIDDEN_SIZE,),
                            minval=-bound1, maxval=bound1, dtype=jnp.float32)

    bound2 = 1.0 / (HIDDEN_SIZE ** 0.5)
    w2 = jax.random.uniform(k2, (HIDDEN_SIZE, OUTPUT_SIZE),
                            minval=-bound2, maxval=bound2, dtype=jnp.float32)
    b2 = jax.random.uniform(kb2, (OUTPUT_SIZE,),
                            minval=-bound2, maxval=bound2, dtype=jnp.float32)

    out = my_model_ff(x, w1, b1, w2, b2)
    out = jax.block_until_ready(out)

    ref = _reference_bf16(x, w1, b1, w2, b2)
    assert out.shape == (B, OUTPUT_SIZE)
    assert jnp.allclose(out, ref, atol=1e-2, rtol=1e-2), "mismatch vs reference"

    print("KERNEL_OK")
</pallas_src>

<mosaic_0001>
module attributes {stable_mosaic.version = 11 : i64} {
  func.func @_ff_kernel(%arg0: i32, %arg1: memref<16x128xbf16, #tpu.memory_space<vmem>>, %arg2: memref<128x1024xbf16, #tpu.memory_space<vmem>>, %arg3: memref<1x1024xf32, #tpu.memory_space<vmem>>, %arg4: memref<1024x128xbf16, #tpu.memory_space<vmem>>, %arg5: memref<1x128xf32, #tpu.memory_space<vmem>>, %arg6: memref<16x128xf32, #tpu.memory_space<vmem>>) attributes {dimension_semantics = [#tpu.dimension_semantics<parallel>], iteration_bounds = array<i64: 1>, scalar_prefetch = 0 : i64, scratch_operands = 0 : i64, tpu.core_type = #tpu.core_type<tc>, window_params = [{transform_indices = @transform_0, window_bounds = array<i64: 16, 128>}, {pipeline_mode = #tpu.pipeline_mode<synchronous>, transform_indices = @transform_1, window_bounds = array<i64: 128, 1024>}, {pipeline_mode = #tpu.pipeline_mode<synchronous>, transform_indices = @transform_2, window_bounds = array<i64: 1, 1024>}, {pipeline_mode = #tpu.pipeline_mode<synchronous>, transform_indices = @transform_3, window_bounds = array<i64: 1024, 128>}, {pipeline_mode = #tpu.pipeline_mode<synchronous>, transform_indices = @transform_4, window_bounds = array<i64: 1, 128>}, {transform_indices = @transform_5, window_bounds = array<i64: 16, 128>}]} {
    %c0 = arith.constant 0 : index
    %c0_0 = arith.constant 0 : index
    %0 = vector.load %arg1[%c0, %c0_0] : memref<16x128xbf16, #tpu.memory_space<vmem>>, vector<16x128xbf16>
    %c0_1 = arith.constant 0 : index
    %c0_2 = arith.constant 0 : index
    %1 = vector.load %arg2[%c0_1, %c0_2] : memref<128x1024xbf16, #tpu.memory_space<vmem>>, vector<128x1024xbf16>
    %cst = arith.constant dense<0.000000e+00> : vector<16x1024xf32>
    %2 = tpu.matmul %0, %1, %cst {dimension_numbers = #tpu.dot_dimension_numbers<[1], [0], [0], [1], [0, 0, 1, 1], [], []>} : vector<16x128xbf16>, vector<128x1024xbf16>, vector<16x1024xf32> -> vector<16x1024xf32>
    %c0_3 = arith.constant 0 : index
    %c0_4 = arith.constant 0 : index
    %3 = vector.load %arg3[%c0_3, %c0_4] : memref<1x1024xf32, #tpu.memory_space<vmem>>, vector<1x1024xf32>
    %4 = vector.broadcast %3 : vector<1x1024xf32> to vector<16x1024xf32>
    %5 = arith.addf %2, %4 : vector<16x1024xf32>
    %cst_5 = arith.constant 0.000000e+00 : f32
    %6 = vector.broadcast %cst_5 : f32 to vector<16x1024xf32>
    %7 = arith.cmpf oge, %5, %6 : vector<16x1024xf32>
    %cst_6 = arith.constant 0.00999999977 : f32
    %8 = vector.broadcast %cst_6 : f32 to vector<16x1024xf32>
    %9 = arith.mulf %8, %5 : vector<16x1024xf32>
    %10 = arith.select %7, %5, %9 : vector<16x1024xi1>, vector<16x1024xf32>
    %11 = arith.truncf %10 : vector<16x1024xf32> to vector<16x1024xbf16>
    %c0_7 = arith.constant 0 : index
    %c0_8 = arith.constant 0 : index
    %12 = vector.load %arg4[%c0_7, %c0_8] : memref<1024x128xbf16, #tpu.memory_space<vmem>>, vector<1024x128xbf16>
    %cst_9 = arith.constant dense<0.000000e+00> : vector<16x128xf32>
    %13 = tpu.matmul %11, %12, %cst_9 {dimension_numbers = #tpu.dot_dimension_numbers<[1], [0], [0], [1], [0, 0, 1, 1], [], []>} : vector<16x1024xbf16>, vector<1024x128xbf16>, vector<16x128xf32> -> vector<16x128xf32>
    %c0_10 = arith.constant 0 : index
    %c0_11 = arith.constant 0 : index
    %14 = vector.load %arg5[%c0_10, %c0_11] : memref<1x128xf32, #tpu.memory_space<vmem>>, vector<1x128xf32>
    %15 = vector.broadcast %14 : vector<1x128xf32> to vector<16x128xf32>
    %16 = arith.addf %13, %15 : vector<16x128xf32>
    %c0_12 = arith.constant 0 : index
    %c0_13 = arith.constant 0 : index
    %17 = vector.load %arg6[%c0_12, %c0_13] : memref<16x128xf32, #tpu.memory_space<vmem>>, vector<16x128xf32>
    tpu.vector_store %arg6[%c0_12, %c0_13], %16 {strides = array<i32>} : memref<16x128xf32, #tpu.memory_space<vmem>>, vector<16x128xf32>,
    return
  }
  func.func @transform_0(%arg0: i32) -> (i32, i32) {
    %c0_i32 = arith.constant 0 : i32
    %c0_i32_0 = arith.constant 0 : i32
    return %arg0, %c0_i32 : i32, i32
  }
  func.func @transform_1(%arg0: i32) -> (i32, i32) {
    %c0_i32 = arith.constant 0 : i32
    %c0_i32_0 = arith.constant 0 : i32
    %c0_i32_1 = arith.constant 0 : i32
    return %c0_i32, %c0_i32_0 : i32, i32
  }
  func.func @transform_2(%arg0: i32) -> (i32, i32) {
    %c0_i32 = arith.constant 0 : i32
    %c0_i32_0 = arith.constant 0 : i32
    %c0_i32_1 = arith.constant 0 : i32
    return %c0_i32, %c0_i32_0 : i32, i32
  }
  func.func @transform_3(%arg0: i32) -> (i32, i32) {
    %c0_i32 = arith.constant 0 : i32
    %c0_i32_0 = arith.constant 0 : i32
    %c0_i32_1 = arith.constant 0 : i32
    return %c0_i32, %c0_i32_0 : i32, i32
  }
  func.func @transform_4(%arg0: i32) -> (i32, i32) {
    %c0_i32 = arith.constant 0 : i32
    %c0_i32_0 = arith.constant 0 : i32
    %c0_i32_1 = arith.constant 0 : i32
    return %c0_i32, %c0_i32_0 : i32, i32
  }
  func.func @transform_5(%arg0: i32) -> (i32, i32) {
    %c0_i32 = arith.constant 0 : i32
    %c0_i32_0 = arith.constant 0 : i32
    return %arg0, %c0_i32 : i32, i32
  }
}

</mosaic_0001>

<bundles_post_ra>
// kernel: my_model_ff.1
= control target key start
LH: loop header
LB: loop body
LE: loop exit
PB: predicated region body
PF: predicated region fallthrough
CT: control target
= control target key end

     0   :  { %v1656_v3 = vmov 0   ;;  %s2123_s1 = inlined_call_operand.vmem [shape: bf16[128,1024], index: 1, kind: input, shape index: {}]   ;;  %s2124_s0 = inlined_call_operand.vmem [shape: bf16[16,128], index: 0, kind: input, shape index: {}]   ;;  %s2125_s3 = inlined_call_operand.vmem [shape: bf16[1024,128], index: 3, kind: input, shape index: {}]   ;;  %s2126_s2 = inlined_call_operand.vmem [shape: f32[1,1024], index: 2, kind: input, shape index: {}]   ;;  %s2127_s4 = inlined_call_operand.vmem [shape: f32[1,128], index: 4, kind: input, shape index: {}]   ;;  %s2128_s5 = inlined_call_operand.vmem [shape: f32[16,128], index: 5, kind: output, shape index: {}]  }
   0x1   :  { %v79_v0 = vld [vmem:[%s2123_s1 + $0x1c0] sm:$0xff]  ;;  %v80_v2 = vld [vmem:[%s2123_s1 + $0x1c8] sm:$0xff]  ;;  %487 = vmatprep.mubr.bf16.mxu0 %v1656_v3  ;;  %530 = vmatprep.mubr.bf16.mxu1 %v1656_v3  ;;  %v81_v60 = vld [vmem:[%s2123_s1 + $0x1d0] sm:$0xff] }
   0x2   :  { %v83_v1 = vld [vmem:[%s2123_s1 + $0x1e0] sm:$0xff]  ;;  %v84_v5 = vld [vmem:[%s2123_s1 + $0x1e8] sm:$0xff]  ;;  %v85_v63 = vld [vmem:[%s2123_s1 + $0x1f0] sm:$0xff] }
   0x3   :  { %v1430_v4 = vcombine.high %v79_v0, %v83_v1  ;;  %v1429_v6 = vcombine.low %v79_v0, %v83_v1  ;;  %v71_v7 = vld [vmem:[%s2123_s1 + $0x180] sm:$0xff]  ;;  %v1432_v9 = vcombine.high %v80_v2, %v84_v5  ;;  %v1431_v10 = vcombine.low %v80_v2, %v84_v5  ;;  %v72_v12 = vld [vmem:[%s2123_s1 + $0x188] sm:$0xff]  ;;  %v82_v1 = vld [vmem:[%s2123_s1 + $0x1d8] sm:$0xff] }
   0x4   :  { %v75_v8 = vld [vmem:[%s2123_s1 + $0x1a0] sm:$0xff]  ;;  %v76_v13 = vld [vmem:[%s2123_s1 + $0x1a8] sm:$0xff]  ;;  %v86_v2 = vld [vmem:[%s2123_s1 + $0x1f8] sm:$0xff] }
   0x5   :  { %v1422_v11 = vcombine.high %v71_v7, %v75_v8  ;;  %v63_v14 = vld [vmem:[%s2123_s1 + $0x140] sm:$0xff]  ;;  %455 = vmatprep.subr.bf16.mxu0 %v1430_v4  ;;  %v1424_v15 = vcombine.high %v72_v12, %v76_v13  ;;  %v64_v17 = vld [vmem:[%s2123_s1 + $0x148] sm:$0xff]  ;;  %498 = vmatprep.subr.bf16.mxu1 %v1432_v9  ;;  %v1421_v19 = vcombine.low %v71_v7, %v75_v8  ;;  %v73_v5 = vld [vmem:[%s2123_s1 + $0x190] sm:$0xff] }
   0x6   :  { %v67_v16 = vld [vmem:[%s2123_s1 + $0x160] sm:$0xff]  ;;  %v68_v18 = vld [vmem:[%s2123_s1 + $0x168] sm:$0xff]  ;;  %456 = vmatpush1.bf16.msra.mxu0 %v1429_v6  ;;  %499 = vmatpush1.bf16.msra.mxu1 %v1431_v10  ;;  %v1423_v20 = vcombine.low %v72_v12, %v76_v13  ;;  %v1434_v8 = vcombine.high %v81_v60, %v85_v63  ;;  %v77_v9 = vld [vmem:[%s2123_s1 + $0x1b0] sm:$0xff]  ;;  %v1436_v10 = vcombine.high %v82_v1, %v86_v2 }
   0x7   :  { %457 = vmatprep.subr.bf16.mxu0 %v1422_v11  ;;  %v1414_v21 = vcombine.high %v63_v14, %v67_v16  ;;  %500 = vmatprep.subr.bf16.mxu1 %v1424_v15  ;;  %v1416_v22 = vcombine.high %v64_v17, %v68_v18  ;;  %v55_v23 = vld [vmem:[%s2123_s1 + $0x100] sm:$0xff]  ;;  %v56_v25 = vld [vmem:[%s2123_s1 + $0x108] sm:$0xff]  ;;  %v1413_v27 = vcombine.low %v63_v14, %v67_v16  ;;  %v74_v11 = vld [vmem:[%s2123_s1 + $0x198] sm:$0xff] }
   0x8   :  { %v59_v24 = vld [vmem:[%s2123_s1 + $0x120] sm:$0xff]  ;;  %v60_v26 = vld [vmem:[%s2123_s1 + $0x128] sm:$0xff]  ;;  %v1415_v28 = vcombine.low %v64_v17, %v68_v18  ;;  %v78_v12 = vld [vmem:[%s2123_s1 + $0x1b8] sm:$0xff]  ;;  %v1433_v13 = vcombine.low %v81_v60, %v85_v63  ;;  %v1435_v15 = vcombine.low %v82_v1, %v86_v2  ;;  %v1426_v16 = vcombine.high %v73_v5, %v77_v9 }
   0x9   :  { %v1406_v29 = vcombine.high %v55_v23, %v59_v24  ;;  %v1408_v30 = vcombine.high %v56_v25, %v60_v26  ;;  %v47_v31 = vld [vmem:[%s2123_s1 + $0xc0] sm:$0xff]  ;;  %v48_v33 = vld [vmem:[%s2123_s1 + $0xc8] sm:$0xff]  ;;  %v1405_v35 = vcombine.low %v55_v23, %v59_v24  ;;  %v1407_v36 = vcombine.low %v56_v25, %v60_v26  ;;  %v65_v14 = vld [vmem:[%s2123_s1 + $0x150] sm:$0xff] }
   0xa   :  { %458 = vmatpush1.bf16.msra.mxu0 %v1421_v19  ;;  %501 = vmatpush1.bf16.msra.mxu1 %v1423_v20  ;;  %v51_v32 = vld [vmem:[%s2123_s1 + $0xe0] sm:$0xff]  ;;  %v52_v34 = vld [vmem:[%s2123_s1 + $0xe8] sm:$0xff]  ;;  %v69_v17 = vld [vmem:[%s2123_s1 + $0x170] sm:$0xff]  ;;  %v1428_v18 = vcombine.high %v74_v11, %v78_v12  ;;  %v1427_v23 = vcombine.low %v74_v11, %v78_v12 }
   0xb   :  { %459 = vmatprep.subr.bf16.mxu0 %v1414_v21  ;;  %502 = vmatprep.subr.bf16.mxu1 %v1416_v22  ;;  %v1398_v37 = vcombine.high %v47_v31, %v51_v32  ;;  %v1400_v38 = vcombine.high %v48_v33, %v52_v34  ;;  %v39_v39 = vld [vmem:[%s2123_s1 + $0x80] sm:$0xff]  ;;  %v40_v41 = vld [vmem:[%s2123_s1 + $0x88] sm:$0xff]  ;;  %v1397_v43 = vcombine.low %v47_v31, %v51_v32  ;;  %v66_v19 = vld [vmem:[%s2123_s1 + $0x158] sm:$0xff] }
   0xc   :  { %v43_v40 = vld [vmem:[%s2123_s1 + $0xa0] sm:$0xff]  ;;  %v44_v42 = vld [vmem:[%s2123_s1 + $0xa8] sm:$0xff]  ;;  %v1399_v44 = vcombine.low %v48_v33, %v52_v34  ;;  %v70_v20 = vld [vmem:[%s2123_s1 + $0x178] sm:$0xff]  ;;  %v1425_v21 = vcombine.low %v73_v5, %v77_v9  ;;  %v1418_v24 = vcombine.high %v65_v14, %v69_v17 }
   0xd   :  { %v1390_v45 = vcombine.high %v39_v39, %v43_v40  ;;  %v1392_v46 = vcombine.high %v40_v41, %v44_v42  ;;  %v31_v47 = vld [vmem:[%s2123_s1 + $0x40] sm:$0xff]  ;;  %v32_v49 = vld [vmem:[%s2123_s1 + $0x48] sm:$0xff]  ;;  %v1389_v51 = vcombine.low %v39_v39, %v43_v40  ;;  %v1391_v52 = vcombine.low %v40_v41, %v44_v42  ;;  %v57_v22 = vld [vmem:[%s2123_s1 + $0x110] sm:$0xff] }
   0xe   :  { %460 = vmatpush1.bf16.msra.mxu0 %v1413_v27  ;;  %503 = vmatpush1.bf16.msra.mxu1 %v1415_v28  ;;  %v35_v48 = vld [vmem:[%s2123_s1 + $0x60] sm:$0xff]  ;;  %v36_v50 = vld [vmem:[%s2123_s1 + $0x68] sm:$0xff]  ;;  %v61_v25 = vld [vmem:[%s2123_s1 + $0x130] sm:$0xff]  ;;  %v1420_v26 = vcombine.high %v66_v19, %v70_v20  ;;  %v1419_v32 = vcombine.low %v66_v19, %v70_v20 }
   0xf   :  { %461 = vmatprep.subr.bf16.mxu0 %v1406_v29  ;;  %504 = vmatprep.subr.bf16.mxu1 %v1408_v30  ;;  %v1382_v53 = vcombine.high %v31_v47, %v35_v48  ;;  %v23_v54 = vld [vmem:[%s2123_s1] sm:$0xff]  ;;  %v1384_v56 = vcombine.high %v32_v49, %v36_v50  ;;  %v24_v57 = vld [vmem:[%s2123_s1 + $0x8] sm:$0xff]  ;;  %v1381_v59 = vcombine.low %v31_v47, %v35_v48  ;;  %v58_v27 = vld [vmem:[%s2123_s1 + $0x118] sm:$0xff] }
  0x10   :  { %v27_v55 = vld [vmem:[%s2123_s1 + $0x20] sm:$0xff]  ;;  %v28_v58 = vld [vmem:[%s2123_s1 + $0x28] sm:$0xff]  ;;  %v1383_v61 = vcombine.low %v32_v49, %v36_v50  ;;  %v62_v28 = vld [vmem:[%s2123_s1 + $0x138] sm:$0xff]  ;;  %v1417_v29 = vcombine.low %v65_v14, %v69_v17  ;;  %v1410_v33 = vcombine.high %v57_v22, %v61_v25 }
  0x11   :  { %v1374_v62 = vcombine.high %v23_v54, %v27_v55  ;;  %v1376_v0 = vcombine.high %v24_v57, %v28_v58  ;;  %v1373_v4 = vcombine.low %v23_v54, %v27_v55  ;;  %v1375_v6 = vcombine.low %v24_v57, %v28_v58  ;;  %v1803_v7 = vld [vmem:[%s2124_s0] sm:$0xff]   ;;  %v49_v30 = vld [vmem:[%s2123_s1 + $0xd0] sm:$0xff]  ;;  %v50_v34 = vld [vmem:[%s2123_s1 + $0xd8] sm:$0xff] }
  0x12   :  { %462 = vmatpush1.bf16.msra.mxu0 %v1405_v35  ;;  %505 = vmatpush1.bf16.msra.mxu1 %v1407_v36  ;;  %v53_v31 = vld [vmem:[%s2123_s1 + $0xf0] sm:$0xff]  ;;  %v1412_v35 = vcombine.high %v58_v27, %v62_v28  ;;  %v1409_v36 = vcombine.low %v57_v22, %v61_v25  ;;  %v1411_v39 = vcombine.low %v58_v27, %v62_v28  ;;  %v42_v41 = vld [vmem:[%s2123_s1 + $0x98] sm:$0xff]  ;;  %v1600_v12 = vld [vmem:[%s2125_s3 + $0x68] sm:$0xff]  }
  0x13   :  { %463 = vmatprep.subr.bf16.mxu0 %v1398_v37  ;;  %506 = vmatprep.subr.bf16.mxu1 %v1400_v38  ;;  %v41_v37 = vld [vmem:[%s2123_s1 + $0x90] sm:$0xff]  ;;  %v1402_v40 = vcombine.high %v49_v30, %v53_v31  ;;  %v46_v42 = vld [vmem:[%s2123_s1 + $0xb8] sm:$0xff]  ;;  %v1602_v14 = vld [vmem:[%s2125_s3 + $0x28] sm:$0xff]  }
  0x14   :  { %v45_v38 = vld [vmem:[%s2123_s1 + $0xb0] sm:$0xff]  ;;  %v34_v49 = vld [vmem:[%s2123_s1 + $0x58] sm:$0xff]  ;;  %v1395_v55 = vcombine.low %v42_v41, %v46_v42  ;;  %v1606_v17 = vld [vmem:[%s2125_s3 + $0x20] sm:$0xff]  }
  0x15   :  { %v1394_v48 = vcombine.high %v41_v37, %v45_v38  ;;  %v38_v50 = vld [vmem:[%s2123_s1 + $0x78] sm:$0xff]  ;;  %v29_v54 = vld [vmem:[%s2123_s1 + $0x30] sm:$0xff]  ;;  %v1616_v27 = vld [vmem:[%s2125_s3 + $0x48] sm:$0xff]  }
  0x16   :  { %464 = vmatpush1.bf16.msra.mxu0 %v1397_v43  ;;  %507 = vmatpush1.bf16.msra.mxu1 %v1399_v44  ;;  %v1401_v44 = vcombine.low %v49_v30, %v53_v31  ;;  %v26_v57 = vld [vmem:[%s2123_s1 + $0x18] sm:$0xff]  ;;  %v1597_v9 = vld [vmem:[%s2125_s3 + $0xf0] sm:$0xff]   ;;  %v1617_v28 = vld [vmem:[%s2125_s3 + $0xc8] sm:$0xff]  }
  0x17   :  { %465 = vmatprep.subr.bf16.mxu0 %v1390_v45  ;;  %508 = vmatprep.subr.bf16.mxu1 %v1392_v46  ;;  %v33_v45 = vld [vmem:[%s2123_s1 + $0x50] sm:$0xff]  ;;  %v30_v58 = vld [vmem:[%s2123_s1 + $0x38] sm:$0xff]  ;;  %v1619_v30 = vld [vmem:[%s2125_s3 + $0x88] sm:$0xff]  }
  0x18   :  { %v37_v46 = vld [vmem:[%s2123_s1 + $0x70] sm:$0xff]  ;;  %v1380_v63 = vcombine.high %v26_v57, %v30_v58  ;;  %v1593_v2 = vld [vmem:[%s2125_s3 + $0xf8] sm:$0xff]   ;;  %v1620_v31 = vld [vmem:[%s2125_s3 + $0x40] sm:$0xff]  }
  0x19   :  { %v1385_v60 = vcombine.low %v33_v45, %v37_v46  ;;  %v1594_v5 = vld [vmem:[%s2125_s3 + $0x38] sm:$0xff]   ;;  %v1599_v11 = vld [vmem:[%s2125_s3 + $0xb0] sm:$0xff]  }
  0x1a   :  { %466 = vmatpush1.bf16.msra.mxu0 %v1389_v51  ;;  %509 = vmatpush1.bf16.msra.mxu1 %v1391_v52  ;;  %v1396_v51 = vcombine.high %v42_v41, %v46_v42  ;;  %v1393_v52 = vcombine.low %v41_v37, %v45_v38  ;;  %v1608_v19 = vld [vmem:[%s2125_s3 + $0x58] sm:$0xff]   ;;  %v1614_v25 = vld [vmem:[%s2125_s3 + $0x10] sm:$0xff]  }
  0x1b   :  { %467 = vmatprep.subr.bf16.mxu0 %v1382_v53  ;;  %510 = vmatprep.subr.bf16.mxu1 %v1384_v56  ;;  %v25_v53 = vld [vmem:[%s2123_s1 + $0x10] sm:$0xff]  ;;  %v1386_v56 = vcombine.high %v33_v45, %v37_v46  ;;  %v1609_v20 = vld [vmem:[%s2125_s3 + $0xd8] sm:$0xff]  }
  0x1c   :  { %v1377_v1 = vcombine.low %v25_v53, %v29_v54  ;;  %v1611_v22 = vld [vmem:[%s2125_s3 + $0x98] sm:$0xff]  }
  0x1e   :  { %468 = vmatpush1.bf16.msra.mxu0 %v1381_v59  ;;  %511 = vmatpush1.bf16.msra.mxu1 %v1383_v61  ;;  %v1388_v59 = vcombine.high %v34_v49, %v38_v50  ;;  %v1387_v61 = vcombine.low %v34_v49, %v38_v50 }
  0x1f   :  { %469 = vmatprep.subr.bf16.mxu0 %v1374_v62  ;;  %512 = vmatprep.subr.bf16.mxu1 %v1376_v0  ;;  %v1378_v62 = vcombine.high %v25_v53, %v29_v54  ;;  %v1592_v0 = vld [vmem:[%s2125_s3 + $0x78] sm:$0xff]  }
  0x22   :  { %470 = vmatpush1.bf16.msra.mxu0 %v1373_v4  ;;  %513 = vmatpush1.bf16.msra.mxu1 %v1375_v6  ;;  %v1379_v4 = vcombine.low %v26_v57, %v30_v58  ;;  %v1595_v6 = vld [vmem:[%s2125_s3 + $0xb8] sm:$0xff]  }
  0x23   :  { %541 = vmatprep.subr.bf16.mxu0 %v1434_v8  ;;  %584 = vmatprep.subr.bf16.mxu1 %v1436_v10  ;;  %v1596_v8 = vld [vmem:[%s2125_s3 + $0x70] sm:$0xff]  }
  0x24   :  { %v1598_v10 = vld [vmem:[%s2125_s3 + $0x30] sm:$0xff]  }
  0x25   :  { %488 = vmatmul.mubr.bf16.vlgmr.msra.gmra.mxu0 %v1803_v7  ;;  %531 = vmatmul.mubr.bf16.vlgmr.msra.gmra.mxu1 %v1803_v7 }
  0x26   :  { %542 = vmatpush1.bf16.msra.mxu0 %v1433_v13  ;;  %585 = vmatpush1.bf16.msra.mxu1 %v1435_v15  ;;  %v1601_v13 = vld [vmem:[%s2125_s3 + $0xe8] sm:$0xff]  }
  0x27   :  { %543 = vmatprep.subr.bf16.mxu0 %v1426_v16  ;;  %586 = vmatprep.subr.bf16.mxu1 %v1428_v18  ;;  %v1603_v15 = vld [vmem:[%s2125_s3 + $0xa8] sm:$0xff]   ;;  %v1605_v16 = vld [vmem:[%s2125_s3 + $0xe0] sm:$0xff]  }
  0x28   :  { %573 = vmatprep.mubr.bf16.mxu0 %v1656_v3  ;;  %616 = vmatprep.mubr.bf16.mxu1 %v1656_v3  ;;  %v54_v3 = vld [vmem:[%s2123_s1 + $0xf8] sm:$0xff]  ;;  %v1607_v18 = vld [vmem:[%s2125_s3 + $0xa0] sm:$0xff]  }
  0x29   :  { %v1404_v43 = vcombine.high %v50_v34, %v54_v3  ;;  %v1403_v47 = vcombine.low %v50_v34, %v54_v3  ;;  %v1623_v34 = vld [vmem:[%s2125_s3 + $0x80] sm:$0xff]   ;;  %v1624_v3 = vld [vmem:[%s2125_s3 + $0x178] sm:$0xff]  }
  0x2a   :  { %544 = vmatpush1.bf16.msra.mxu0 %v1425_v21  ;;  %587 = vmatpush1.bf16.msra.mxu1 %v1427_v23  ;;  %v1610_v21 = vld [vmem:[%s2125_s3 + $0x18] sm:$0xff]   ;;  %v1612_v23 = vld [vmem:[%s2125_s3 + $0x50] sm:$0xff]  }
  0x2b   :  { %545 = vmatprep.subr.bf16.mxu0 %v1418_v24  ;;  %588 = vmatprep.subr.bf16.mxu1 %v1420_v26  ;;  %v1613_v24 = vld [vmem:[%s2125_s3 + $0xd0] sm:$0xff]  }
  0x2c   :  { %v1615_v26 = vld [vmem:[%s2125_s3 + $0x90] sm:$0xff]  }
  0x2e   :  { %546 = vmatpush1.bf16.msra.mxu0 %v1417_v29  ;;  %589 = vmatpush1.bf16.msra.mxu1 %v1419_v32  ;;  %v1618_v29 = vld [vmem:[%s2125_s3 + $0x8] sm:$0xff]   ;;  %v1621_v32 = vld [vmem:[%s2125_s3 + $0xc0] sm:$0xff]  }
  0x2f   :  { %547 = vmatprep.subr.bf16.mxu0 %v1410_v33  ;;  %590 = vmatprep.subr.bf16.mxu1 %v1412_v35  ;;  %v1622_v33 = vld [vmem:[%s2125_s3] sm:$0xff]   ;;  %v1625_v35 = vld [vmem:[%s2125_s3 + $0x1f8] sm:$0xff]  }
  0x32   :  { %548 = vmatpush1.bf16.msra.mxu0 %v1409_v36  ;;  %591 = vmatpush1.bf16.msra.mxu1 %v1411_v39  ;;  %v89_v36 = vlaneseq  ;;  %v2000_v39 = vld [vmem:[%s2126_s2] sm:$0xff] }
  0x33   :  { %549 = vmatprep.subr.bf16.mxu0 %v1402_v40  ;;  %592 = vmatprep.subr.bf16.mxu1 %v1404_v43 }
  0x34   :  { %v1994_v37 = vshrl.u32 %v89_v36, 7 }
  0x36   :  { %550 = vmatpush1.bf16.msra.mxu0 %v1401_v44  ;;  %593 = vmatpush1.bf16.msra.mxu1 %v1403_v47  ;;  %v91_v38 = vsub.s32 0, %v1994_v37  ;;  %v95_v40 = vsub.s32 1, %v1994_v37  ;;  %v103_v41 = vsub.s32 3, %v1994_v37  ;;  %v99_v42 = vsub.s32 2, %v1994_v37 }
  0x37   :  { %551 = vmatprep.subr.bf16.mxu0 %v1394_v48  ;;  %594 = vmatprep.subr.bf16.mxu1 %v1396_v51  ;;  %v111_v36 = vsub.s32 5, %v1994_v37 }
  0x38   :  { %v92_v43 = vrot.slane %v2000_v39, %v91_v38  ;;  %v96_v44 = vrot.slane %v2000_v39, %v95_v40  ;;  %v104_v46 = vrot.slane %v2000_v39, %v103_v41  ;;  %v100_v47 = vrot.slane %v2000_v39, %v99_v42  ;;  %v1642_v38 = vld [vmem:[%s2125_s3 + $0x118] sm:$0xff]  }
  0x39   :  { %v119_v40 = vsub.s32 7, %v1994_v37  ;;  %v115_v41 = vsub.s32 6, %v1994_v37  ;;  %v1643_v42 = vld [vmem:[%s2125_s3 + $0x198] sm:$0xff]  }
  0x3a   :  { %552 = vmatpush1.bf16.msra.mxu0 %v1393_v52  ;;  %595 = vmatpush1.bf16.msra.mxu1 %v1395_v55 }
  0x3b   :  { %553 = vmatprep.subr.bf16.mxu0 %v1386_v56  ;;  %596 = vmatprep.subr.bf16.mxu1 %v1388_v59 }
  0x3e   :  { %554 = vmatpush1.bf16.msra.mxu0 %v1385_v60  ;;  %597 = vmatpush1.bf16.msra.mxu1 %v1387_v61 }
  0x3f   :  { %555 = vmatprep.subr.bf16.mxu0 %v1378_v62  ;;  %598 = vmatprep.subr.bf16.mxu1 %v1380_v63 }
  0x42   :  { %556 = vmatpush1.bf16.msra.mxu0 %v1377_v1  ;;  %599 = vmatpush1.bf16.msra.mxu1 %v1379_v4 }
  0x43   :  { %1502 = vmatprep.subr.bf16.mxu0 %v1592_v0  ;;  %1524 = vmatprep.subr.bf16.mxu1 %v1593_v2 }
  0x45   :  { %574 = vmatmul.mubr.bf16.vlgmr.msra.gmra.mxu0 %v1803_v7  ;;  %617 = vmatmul.mubr.bf16.vlgmr.msra.gmra.mxu1 %v1803_v7  ;;  %v1604_v7 = vld [vmem:[%s2125_s3 + $0x60] sm:$0xff]  }
  0x46   :  { %1503 = vmatpush3.bf16.msra.mxu0 %v1594_v5  ;;  %1525 = vmatpush3.bf16.msra.mxu1 %v1595_v6 }
  0x47   :  { %1504 = vmatprep.subr.bf16.mxu0 %v1596_v8  ;;  %1526 = vmatprep.subr.bf16.mxu1 %v1597_v9 }
  0x4a   :  { %1505 = vmatpush3.bf16.msra.mxu0 %v1598_v10  ;;  %1527 = vmatpush3.bf16.msra.mxu1 %v1599_v11 }
  0x4b   :  { %1506 = vmatprep.subr.bf16.mxu0 %v1600_v12  ;;  %1528 = vmatprep.subr.bf16.mxu1 %v1601_v13 }
  0x4e   :  { %1507 = vmatpush3.bf16.msra.mxu0 %v1602_v14  ;;  %1529 = vmatpush3.bf16.msra.mxu1 %v1603_v15 }
  0x4f   :  { %1508 = vmatprep.subr.bf16.mxu0 %v1604_v7  ;;  %1530 = vmatprep.subr.bf16.mxu1 %v1605_v16  ;;  %v1626_v16 = vld [vmem:[%s2125_s3 + $0x138] sm:$0xff]  }
  0x52   :  { %1509 = vmatpush3.bf16.msra.mxu0 %v1606_v17  ;;  %1531 = vmatpush3.bf16.msra.mxu1 %v1607_v18 }
  0x53   :  { %1510 = vmatprep.subr.bf16.mxu0 %v1608_v19  ;;  %1532 = vmatprep.subr.bf16.mxu1 %v1609_v20  ;;  %v1627_v20 = vld [vmem:[%s2125_s3 + $0x1b8] sm:$0xff]  }
  0x56   :  { %1511 = vmatpush3.bf16.msra.mxu0 %v1610_v21  ;;  %1533 = vmatpush3.bf16.msra.mxu1 %v1611_v22  ;;  %v1628_v21 = vld [vmem:[%s2125_s3 + $0x170] sm:$0xff]  }
  0x57   :  { %1512 = vmatprep.subr.bf16.mxu0 %v1612_v23  ;;  %1534 = vmatprep.subr.bf16.mxu1 %v1613_v24  ;;  %v1629_v23 = vld [vmem:[%s2125_s3 + $0x1f0] sm:$0xff]  }
  0x58   :  { %v1630_v24 = vld [vmem:[%s2125_s3 + $0x130] sm:$0xff]  }
  0x5a   :  { %1513 = vmatpush3.bf16.msra.mxu0 %v1614_v25  ;;  %1535 = vmatpush3.bf16.msra.mxu1 %v1615_v26  ;;  %v1631_v25 = vld [vmem:[%s2125_s3 + $0x1b0] sm:$0xff]   ;;  %v1632_v26 = vld [vmem:[%s2125_s3 + $0x168] sm:$0xff]  }
  0x5b   :  { %1514 = vmatprep.subr.bf16.mxu0 %v1616_v27  ;;  %1536 = vmatprep.subr.bf16.mxu1 %v1617_v28  ;;  %v1633_v27 = vld [vmem:[%s2125_s3 + $0x1e8] sm:$0xff]  }
  0x5c   :  { %v1634_v28 = vld [vmem:[%s2125_s3 + $0x128] sm:$0xff]  }
  0x5e   :  { %1515 = vmatpush3.bf16.msra.mxu0 %v1618_v29  ;;  %1537 = vmatpush3.bf16.msra.mxu1 %v1619_v30  ;;  %v1635_v29 = vld [vmem:[%s2125_s3 + $0x1a8] sm:$0xff]   ;;  %v1636_v30 = vld [vmem:[%s2125_s3 + $0x160] sm:$0xff]  }
  0x5f   :  { %1516 = vmatprep.subr.bf16.mxu0 %v1620_v31  ;;  %1538 = vmatprep.subr.bf16.mxu1 %v1621_v32  ;;  %v1637_v31 = vld [vmem:[%s2125_s3 + $0x1e0] sm:$0xff]  }
  0x60   :  { %v1638_v32 = vld [vmem:[%s2125_s3 + $0x120] sm:$0xff]  }
  0x62   :  { %1517 = vmatpush3.bf16.msra.mxu0 %v1622_v33  ;;  %1539 = vmatpush3.bf16.msra.mxu1 %v1623_v34  ;;  %v1639_v33 = vld [vmem:[%s2125_s3 + $0x1a0] sm:$0xff]   ;;  %v1640_v34 = vld [vmem:[%s2125_s3 + $0x158] sm:$0xff]  }
  0x63   :  { %1546 = vmatprep.subr.bf16.mxu0 %v1624_v3  ;;  %1568 = vmatprep.subr.bf16.mxu1 %v1625_v35  ;;  %v1641_v3 = vld [vmem:[%s2125_s3 + $0x1d8] sm:$0xff]   ;;  %v107_v35 = vsub.s32 4, %v1994_v37  ;;  %v120_v37 = vrot.slane %v2000_v39, %v119_v40 }
  0xe5   :  { %v489_v45 = vpop.f32.mrf.mxu0  ;;  %v532_v48 = vpop.f32.mrf.mxu1 }
  0xe6   :  { %v490_v49 = vadd.f32 %v489_v45, %v92_v43  ;;  %v533_v55 = vadd.f32 %v532_v48, %v100_v47  ;;  %v1645_v45 = vld [vmem:[%s2125_s3 + $0x1d0] sm:$0xff]  }
  0xe7   :  { %v491_v50 = vpop.f32.mrf.mxu0  ;;  %v534_v52 = vpop.f32.mrf.mxu1  ;;  %v1646_v48 = vld [vmem:[%s2125_s3 + $0x110] sm:$0xff]  }
  0xe8   :  { %v492_v51 = vadd.f32 %v491_v50, %v96_v44  ;;  %v535_v53 = vadd.f32 %v534_v52, %v104_v46  ;;  %vm627_vm0 = vcmp.ge.f32.partialorder %v490_v49, 0.0  ;;  %v643_v58 = vmul.f32 0.01, %v490_v49  ;;  %v1648_v52 = vld [vmem:[%s2125_s3 + $0x148] sm:$0xff]  }
  0xe9   :  { %v493_v54 = vpop.f32.mrf.mxu0  ;;  %v536_v57 = vpop.f32.mrf.mxu1  ;;  %v645_v5 = vmul.f32 0.01, %v533_v55  ;;  %vm629_vm6 = vcmp.ge.f32.partialorder %v533_v55, 0.0 }
  0xea   :  { %v494_v56 = vadd.f32 %v493_v54, %v92_v43  ;;  %vm628_vm1 = vcmp.ge.f32.partialorder %v492_v51, 0.0  ;;  %v537_v59 = vadd.f32 %v536_v57, %v100_v47  ;;  %v644_v61 = vmul.f32 0.01, %v492_v51  ;;  %v1644_v43 = vld [vmem:[%s2125_s3 + $0x150] sm:$0xff]  }
  0xeb   :  { %v495_v60 = vpop.f32.mrf.mxu0  ;;  %v538_v0 = vpop.f32.mrf.mxu1  ;;  %v646_v1 = vmul.f32 0.01, %v535_v53  ;;  %vm630_vm4 = vcmp.ge.f32.partialorder %v535_v53, 0.0  ;;  %v659_v13 = vsel %vm627_vm0, %v490_v49, %v643_v58  ;;  %v661_v17 = vsel %vm629_vm6, %v533_v55, %v645_v5  ;;  %v1649_v55 = vld [vmem:[%s2125_s3 + $0x1c8] sm:$0xff]   ;;  %v1653_v5 = vld [vmem:[%s2125_s3 + $0x1c0] sm:$0xff]  }
  0xec   :  { %vm635_vm2 = vcmp.ge.f32.partialorder %v494_v56, 0.0  ;;  %v651_v62 = vmul.f32 0.01, %v494_v56  ;;  %v496_v63 = vadd.f32 %v495_v60, %v96_v44  ;;  %vm637_vm3 = vcmp.ge.f32.partialorder %v537_v59, 0.0 }
  0xed   :  { %v653_v2 = vmul.f32 0.01, %v537_v59  ;;  %v539_v4 = vadd.f32 %v538_v0, %v104_v46  ;;  %v660_v11 = vsel %vm628_vm1, %v492_v51, %v644_v61  ;;  %v662_v15 = vsel %vm630_vm4, %v535_v53, %v646_v1  ;;  %v1647_v51 = vld [vmem:[%s2125_s3 + $0x190] sm:$0xff]   ;;  %v1652_v0 = vld [vmem:[%s2125_s3 + $0x140] sm:$0xff]  }
  0xee   :  { %vm636_vm5 = vcmp.ge.f32.partialorder %v496_v63, 0.0  ;;  %v652_v6 = vmul.f32 0.01, %v496_v63  ;;  %v667_v8 = vsel %vm635_vm2, %v494_v56, %v651_v62  ;;  %v108_v44 = vrot.slane %v2000_v39, %v107_v35 }
  0xef   :  { %vm638_vm7 = vcmp.ge.f32.partialorder %v539_v4, 0.0  ;;  %v654_v9 = vmul.f32 0.01, %v539_v4  ;;  %v669_v10 = vsel %vm637_vm3, %v537_v59, %v653_v2  ;;  %v675_v18 = vpack.c.bf16 %v667_v8, %v659_v13  ;;  %v1650_v59 = vld [vmem:[%s2125_s3 + $0x108] sm:$0xff]  }
  0xf0   :  { %v668_v12 = vsel %vm636_vm5, %v496_v63, %v652_v6  ;;  %v677_v22 = vpack.c.bf16 %v669_v10, %v661_v17  ;;  %v112_v46 = vrot.slane %v2000_v39, %v111_v36  ;;  %v116_v49 = vrot.slane %v2000_v39, %v115_v41  ;;  %v1651_v63 = vld [vmem:[%s2125_s3 + $0x188] sm:$0xff]   ;;  %v1437_v36 = vld [vmem:[%s2127_s4] ss:$0 sm:$0xff] }
  0xf1   :  { %v676_v14 = vpack.c.bf16 %v668_v12, %v660_v11  ;;  %v670_v7 = vsel %vm638_vm7, %v539_v4, %v654_v9  ;;  %v1654_v11 = vld [vmem:[%s2125_s3 + $0x100] sm:$0xff]  }
  0xf2   :  { %v678_v19 = vpack.c.bf16 %v670_v7, %v662_v15  ;;  %v1655_v15 = vld [vmem:[%s2125_s3 + $0x180] sm:$0xff]  }
  0xf3   :  { %1234 = vmatprep.mubr.bf16.mxu0 %v676_v14 }
  0xf4   :  { %1275 = vmatprep.mubr.bf16.mxu1 %v678_v19  ;;  %1235 = vmatmul.mubr.bf16.vlgmr.msra.gmra.mxu0 %v675_v18 }
  0xf5   :  { %1276 = vmatmul.mubr.bf16.vlgmr.msra.gmra.mxu1 %v677_v22  ;;  %1547 = vmatpush3.bf16.msra.mxu0 %v1626_v16 }
  0xf6   :  { %1569 = vmatpush3.bf16.msra.mxu1 %v1627_v20  ;;  %1548 = vmatprep.subr.bf16.mxu0 %v1628_v21 }
  0xf7   :  { %1570 = vmatprep.subr.bf16.mxu1 %v1629_v23 }
  0xf9   :  { %1549 = vmatpush3.bf16.msra.mxu0 %v1630_v24 }
  0xfa   :  { %1571 = vmatpush3.bf16.msra.mxu1 %v1631_v25  ;;  %1550 = vmatprep.subr.bf16.mxu0 %v1632_v26 }
  0xfb   :  { %1572 = vmatprep.subr.bf16.mxu1 %v1633_v27 }
  0xfd   :  { %1551 = vmatpush3.bf16.msra.mxu0 %v1634_v28 }
  0xfe   :  { %1573 = vmatpush3.bf16.msra.mxu1 %v1635_v29  ;;  %1552 = vmatprep.subr.bf16.mxu0 %v1636_v30 }
  0xff   :  { %1574 = vmatprep.subr.bf16.mxu1 %v1637_v31 }
 0x101   :  { %1553 = vmatpush3.bf16.msra.mxu0 %v1638_v32 }
 0x102   :  { %1575 = vmatpush3.bf16.msra.mxu1 %v1639_v33  ;;  %1554 = vmatprep.subr.bf16.mxu0 %v1640_v34 }
 0x103   :  { %1576 = vmatprep.subr.bf16.mxu1 %v1641_v3 }
 0x105   :  { %v575_v47 = vpop.f32.mrf.mxu0  ;;  %1555 = vmatpush3.bf16.msra.mxu0 %v1642_v38  ;;  %v618_v50 = vpop.f32.mrf.mxu1 }
 0x106   :  { %1577 = vmatpush3.bf16.msra.mxu1 %v1643_v42  ;;  %1556 = vmatprep.subr.bf16.mxu0 %v1644_v43  ;;  %v576_v53 = vadd.f32 %v575_v47, %v108_v44  ;;  %v619_v60 = vadd.f32 %v618_v50, %v116_v49 }
 0x107   :  { %v577_v54 = vpop.f32.mrf.mxu0  ;;  %1578 = vmatprep.subr.bf16.mxu1 %v1645_v45  ;;  %v620_v39 = vpop.f32.mrf.mxu1 }
 0x108   :  { %v578_v56 = vadd.f32 %v577_v54, %v112_v46  ;;  %v621_v57 = vadd.f32 %v620_v39, %v120_v37  ;;  %vm631_vm8 = vcmp.ge.f32.partialorder %v576_v53, 0.0  ;;  %v647_v1 = vmul.f32 0.01, %v576_v53 }
 0x109   :  { %v579_v58 = vpop.f32.mrf.mxu0  ;;  %1557 = vmatpush3.bf16.msra.mxu0 %v1646_v48  ;;  %v622_v62 = vpop.f32.mrf.mxu1  ;;  %v649_v7 = vmul.f32 0.01, %v619_v60  ;;  %vm633_vm14 = vcmp.ge.f32.partialorder %v619_v60, 0.0 }
 0x10a   :  { %v580_v61 = vadd.f32 %v579_v58, %v108_v44  ;;  %1579 = vmatpush3.bf16.msra.mxu1 %v1647_v51  ;;  %1558 = vmatprep.subr.bf16.mxu0 %v1648_v52  ;;  %vm632_vm9 = vcmp.ge.f32.partialorder %v578_v56, 0.0  ;;  %v623_v2 = vadd.f32 %v622_v62, %v116_v49  ;;  %v648_v6 = vmul.f32 0.01, %v578_v56 }
 0x10b   :  { %v581_v4 = vpop.f32.mrf.mxu0  ;;  %1580 = vmatprep.subr.bf16.mxu1 %v1649_v55  ;;  %v624_v10 = vpop.f32.mrf.mxu1  ;;  %v650_v12 = vmul.f32 0.01, %v621_v57  ;;  %vm634_vm12 = vcmp.ge.f32.partialorder %v621_v57, 0.0  ;;  %v663_v22 = vsel %vm631_vm8, %v576_v53, %v647_v1  ;;  %v665_v26 = vsel %vm633_vm14, %v619_v60, %v649_v7 }
 0x10c   :  { %vm639_vm10 = vcmp.ge.f32.partialorder %v580_v61, 0.0  ;;  %v655_v8 = vmul.f32 0.01, %v580_v61  ;;  %v582_v9 = vadd.f32 %v581_v4, %v112_v46  ;;  %vm641_vm11 = vcmp.ge.f32.partialorder %v623_v2, 0.0 }
 0x10d   :  { %v657_v13 = vmul.f32 0.01, %v623_v2  ;;  %v625_v14 = vadd.f32 %v624_v10, %v120_v37  ;;  %1559 = vmatpush3.bf16.msra.mxu0 %v1650_v59  ;;  %v664_v20 = vsel %vm632_vm9, %v578_v56, %v648_v6  ;;  %v666_v24 = vsel %vm634_vm12, %v621_v57, %v650_v12 }
 0x10e   :  { %vm640_vm13 = vcmp.ge.f32.partialorder %v582_v9, 0.0  ;;  %v656_v16 = vmul.f32 0.01, %v582_v9  ;;  %1581 = vmatpush3.bf16.msra.mxu1 %v1651_v63  ;;  %1560 = vmatprep.subr.bf16.mxu0 %v1652_v0  ;;  %v671_v17 = vsel %vm639_vm10, %v580_v61, %v655_v8 }
 0x10f   :  { %vm642_vm15 = vcmp.ge.f32.partialorder %v625_v14, 0.0  ;;  %v658_v18 = vmul.f32 0.01, %v625_v14  ;;  %1582 = vmatprep.subr.bf16.mxu1 %v1653_v5  ;;  %v673_v19 = vsel %vm641_vm11, %v623_v2, %v657_v13  ;;  %v679_v27 = vpack.c.bf16 %v671_v17, %v663_v22 }
 0x110   :  { %v672_v21 = vsel %vm640_vm13, %v582_v9, %v656_v16  ;;  %v681_v29 = vpack.c.bf16 %v673_v19, %v665_v26 }
 0x111   :  { %1561 = vmatpush3.bf16.msra.mxu0 %v1654_v11  ;;  %v680_v23 = vpack.c.bf16 %v672_v21, %v664_v20  ;;  %v674_v25 = vsel %vm642_vm15, %v625_v14, %v658_v18 }
 0x112   :  { %1583 = vmatpush3.bf16.msra.mxu1 %v1655_v15  ;;  %v682_v28 = vpack.c.bf16 %v674_v25, %v666_v24 }
 0x113   :  { %1316 = vmatprep.mubr.bf16.mxu0 %v680_v23 }
 0x114   :  { %1357 = vmatprep.mubr.bf16.mxu1 %v682_v28  ;;  %1317 = vmatmul.mubr.bf16.vlgmr.msra.gmra.mxu0 %v679_v27 }
 0x115   :  { %1358 = vmatmul.mubr.bf16.vlgmr.msra.gmra.mxu1 %v681_v29 }
 0x1b4   :  { %v1518_v30 = vpop.f32.mrf.mxu0 }
 0x1b5   :  { %v1540_v31 = vpop.f32.mrf.mxu1 }
 0x1b6   :  { %v1519_v32 = vpop.f32.mrf.mxu0 }
 0x1b7   :  { %v1541_v33 = vpop.f32.mrf.mxu1  ;;  %v1520_v3 = vadd.f32 %v1519_v32, %v1518_v30 }
 0x1b8   :  { %v1521_v34 = vpop.f32.mrf.mxu0  ;;  %v1542_v44 = vadd.f32 %v1541_v33, %v1540_v31 }
 0x1b9   :  { %v1543_v35 = vpop.f32.mrf.mxu1  ;;  %v1237_v40 = vadd.f32 %v1520_v3, %v1437_v36 }
 0x1ba   :  { %v1522_v38 = vpop.f32.mrf.mxu0 }
 0x1bb   :  { %v1523_v41 = vadd.f32 %v1522_v38, %v1521_v34  ;;  %v1544_v42 = vpop.f32.mrf.mxu1  ;;  %v1278_v47 = vadd.f32 %v1542_v44, %v1237_v40 }
 0x1bc   :  { %v1545_v51 = vadd.f32 %v1544_v42, %v1543_v35 }
 0x1bd   :  { %v1240_v37 = vadd.f32 %v1523_v41, %v1437_v36 }
 0x1bf   :  { %v1281_v56 = vadd.f32 %v1545_v51, %v1240_v37 }
 0x1d4   :  { %v1562_v43 = vpop.f32.mrf.mxu0 }
 0x1d5   :  { %v1584_v45 = vpop.f32.mrf.mxu1 }
 0x1d6   :  { %v1563_v46 = vpop.f32.mrf.mxu0 }
 0x1d7   :  { %v1564_v48 = vadd.f32 %v1563_v46, %v1562_v43  ;;  %v1585_v49 = vpop.f32.mrf.mxu1 }
 0x1d8   :  { %v1565_v50 = vpop.f32.mrf.mxu0  ;;  %v1586_v53 = vadd.f32 %v1585_v49, %v1584_v45 }
 0x1d9   :  { %v1319_v52 = vadd.f32 %v1564_v48, %v1278_v47  ;;  %v1587_v54 = vpop.f32.mrf.mxu1 }
 0x1da   :  { %v1566_v55 = vpop.f32.mrf.mxu0 }
 0x1db   :  { %v1360_v39 = vadd.f32 %v1586_v53, %v1319_v52  ;;  %v1567_v57 = vadd.f32 %v1566_v55, %v1565_v50  ;;  %v1588_v58 = vpop.f32.mrf.mxu1 }
 0x1dc   :  { %v1589_v60 = vadd.f32 %v1588_v58, %v1587_v54 }
 0x1dd   :  { %1366 = vst [vmem:[%s2128_s5] sm:$0xff] %v1360_v39  ;;  %v1322_v59 = vadd.f32 %v1567_v57, %v1281_v56 }
 0x1df   :  { %v1363_v61 = vadd.f32 %v1589_v60, %v1322_v59 }
 0x1e1   :  { %1367 = vst [vmem:[%s2128_s5 + $0x8] sm:$0xff] %v1363_v61 }

</bundles_post_ra>
